<compile_context>
chip_gen: v7x
topology: tpu7x:2x2x1
jax: 0.10.0
libtpu: 0.0.40
codegen_flags: <defaults>
</compile_context>

<pallas_src>
import functools

import jax
import jax.numpy as jnp
from jax.experimental import pallas as pl
from jax.experimental.pallas import tpu as pltpu


EPS = 1e-6


def _round_up(n, m):
    return ((n + m - 1) // m) * m


def sublayer_connection_kernel(x_ref, w_ref, bias_ref, gamma_ref, beta_ref,
                               o_ref, normed_ref):
    # Grid: (row_tiles, col_tiles). x_ref is the full-D row tile (resident across j),
    # w_ref / bias_ref / o_ref are the j-th output-column slice.
    j = pl.program_id(1)
    tn = o_ref.shape[-1]

    # ---- LayerNorm: compute once per row tile, cache in VMEM scratch ----
    @pl.when(j == 0)
    def _():
        x = x_ref[...].astype(jnp.float32)
        d = x.shape[-1]
        mean = jnp.mean(x, axis=-1, keepdims=True)
        centered = x - mean
        # torch.std default: unbiased (divide by N-1).
        var_unbiased = jnp.sum(centered * centered, axis=-1, keepdims=True) / (d - 1)
        # Per-row (TM,1) reciprocal instead of a TM*D broadcast divide.
        inv = 1.0 / (jnp.sqrt(var_unbiased) + EPS)
        normed = (gamma_ref[...].astype(jnp.float32) * (centered * inv)
                  + beta_ref[...].astype(jnp.float32))
        normed_ref[...] = normed.astype(normed_ref.dtype)

    # ---- sublayer: Linear(D, D), this output-column block on the MXU ----
    # Feed the MXU in the weight dtype (bf16 for bf16 models); accumulate in f32.
    normed = normed_ref[...].astype(w_ref.dtype)
    y = jnp.dot(normed, w_ref[...], preferred_element_type=jnp.float32)
    y = y + bias_ref[...].astype(jnp.float32)

    # ---- dropout (inference mode => identity) + residual ----
    # TODO(synk): training-mode dropout (PRNG mask + 1/(1-p) scaling) not implemented; eval semantics only.
    col0 = pl.multiple_of(j * tn, tn)
    x_slice = x_ref[:, pl.ds(col0, tn)].astype(jnp.float32)
    o_ref[...] = (x_slice + y).astype(o_ref.dtype)


@functools.partial(jax.jit, static_argnames=("row_tile", "col_tile"))
def sublayer_connection(x, w, bias, gamma, beta, *, row_tile=256, col_tile=512):
    """x: [B, S, D]; w: [D, D]; bias/gamma/beta: [D]."""
    B, S, D = x.shape
    assert D > 1, "unbiased std needs at least 2 features"
    n_rows = B * S
    x2 = x.reshape(n_rows, D)

    # Output-feature tile for the weight (bounds resident weight VMEM; keeps
    # double-buffering affordable on v7x's 64 MiB VMEM for large D).
    tn = col_tile if (D > col_tile and D % col_tile == 0) else D
    # Row tile: big enough to keep the MXU busy, clamped/padded for small inputs.
    tm = min(row_tile, _round_up(n_rows, 8))
    padded_rows = _round_up(n_rows, tm)
    if padded_rows != n_rows:
        x2 = jnp.pad(x2, ((0, padded_rows - n_rows), (0, 0)))

    bias2 = bias.reshape(1, D)
    gamma2 = gamma.reshape(1, D)
    beta2 = beta.reshape(1, D)

    itemsize = jnp.dtype(x.dtype).itemsize
    cost = pl.CostEstimate(
        flops=2 * padded_rows * D * D,
        transcendentals=0,
        bytes_accessed=(2 * padded_rows * D + D * D + 3 * D) * itemsize,
    )

    out = pl.pallas_call(
        sublayer_connection_kernel,
        out_shape=jax.ShapeDtypeStruct((padded_rows, D), x.dtype),
        grid_spec=pltpu.PrefetchScalarGridSpec(
            num_scalar_prefetch=0,
            grid=(padded_rows // tm, D // tn),
            in_specs=[
                pl.BlockSpec((tm, D), lambda i, j: (i, 0)),   # x row tile (resident over j)
                pl.BlockSpec((D, tn), lambda i, j: (0, j)),   # weight column tile
                pl.BlockSpec((1, tn), lambda i, j: (0, j)),   # bias column tile
                pl.BlockSpec((1, D), lambda i, j: (0, 0)),    # gamma (a_2), invariant
                pl.BlockSpec((1, D), lambda i, j: (0, 0)),    # beta  (b_2), invariant
            ],
            out_specs=pl.BlockSpec((tm, tn), lambda i, j: (i, j)),
            scratch_shapes=[pltpu.VMEM((tm, D), x.dtype)],    # cached LayerNorm output
        ),
        compiler_params=pltpu.CompilerParams(
            # Rows shard across TensorCores (v7x megacore); the column axis carries
            # the cached-norm reuse so it must stay sequential.
            dimension_semantics=("parallel", "arbitrary"),
            vmem_limit_bytes=48 * 1024 * 1024,
        ),
        cost_estimate=cost,
    )(x2, w, bias2, gamma2, beta2)

    return out[:n_rows].reshape(B, S, D)


def reference(x, w, bias, gamma, beta):
    """Pure-JAX reference mirroring the PyTorch forward (eval mode)."""
    mean = jnp.mean(x, axis=-1, keepdims=True)
    centered = x - mean
    d = x.shape[-1]
    std = jnp.sqrt(jnp.sum(centered * centered, axis=-1, keepdims=True) / (d - 1))
    normed = gamma * centered / (std + EPS) + beta
    y = normed @ w + bias
    return x + y


if __name__ == "__main__":
    # D is a multiple of 128 so output stores are lane-dense (unmasked vst).
    B, S, D = 2, 8, 128

    key = jax.random.PRNGKey(0)
    kx, kw, kb = jax.random.split(key, 3)

    x = jax.random.normal(kx, (B, S, D), dtype=jnp.float32)

    # Deterministic sublayer (Linear) params and LayerNorm params.
    w = jax.random.normal(kw, (D, D), dtype=jnp.float32) * 0.05
    bias = jax.random.normal(kb, (D,), dtype=jnp.float32) * 0.01
    gamma = jnp.ones((D,), dtype=jnp.float32)   # a_2
    beta = jnp.zeros((D,), dtype=jnp.float32)   # b_2

    out = sublayer_connection(x, w, bias, gamma, beta)
    out = jax.block_until_ready(out)

    ref = reference(x, w, bias, gamma, beta)
    assert out.shape == (B, S, D)
    assert jnp.allclose(out, ref, atol=1e-4, rtol=1e-4), "mismatch vs reference"

    print("KERNEL_OK")
</pallas_src>

<mosaic_0001>
module attributes {stable_mosaic.version = 11 : i64} {
  func.func @sublayer_connection_kernel(%arg0: i32, %arg1: i32, %arg2: memref<16x128xf32, #tpu.memory_space<vmem>>, %arg3: memref<128x128xf32, #tpu.memory_space<vmem>>, %arg4: memref<1x128xf32, #tpu.memory_space<vmem>>, %arg5: memref<1x128xf32, #tpu.memory_space<vmem>>, %arg6: memref<1x128xf32, #tpu.memory_space<vmem>>, %arg7: memref<16x128xf32, #tpu.memory_space<vmem>>, %arg8: memref<16x128xf32, #tpu.memory_space<vmem>>) attributes {dimension_semantics = [#tpu.dimension_semantics<parallel>, #tpu.dimension_semantics<arbitrary>], iteration_bounds = array<i64: 1, 1>, scalar_prefetch = 0 : i64, scratch_operands = 1 : i64, tpu.core_type = #tpu.core_type<tc>, window_params = [{transform_indices = @transform_0, window_bounds = array<i64: 16, 128>}, {transform_indices = @transform_1, window_bounds = array<i64: 128, 128>}, {transform_indices = @transform_2, window_bounds = array<i64: 1, 128>}, {pipeline_mode = #tpu.pipeline_mode<synchronous>, transform_indices = @transform_3, window_bounds = array<i64: 1, 128>}, {pipeline_mode = #tpu.pipeline_mode<synchronous>, transform_indices = @transform_4, window_bounds = array<i64: 1, 128>}, {transform_indices = @transform_5, window_bounds = array<i64: 16, 128>}]} {
    %c0_i32 = arith.constant 0 : i32
    %0 = arith.cmpi eq, %arg1, %c0_i32 : i32
    %1 = arith.extui %0 : i1 to i32
    %c0_i32_0 = arith.constant 0 : i32
    %2 = arith.cmpi ne, %1, %c0_i32_0 : i32
    scf.if %2 {
      %c0_9 = arith.constant 0 : index
      %c0_10 = arith.constant 0 : index
      %15 = vector.load %arg2[%c0_9, %c0_10] : memref<16x128xf32, #tpu.memory_space<vmem>>, vector<16x128xf32>
      %cst_11 = arith.constant dense<0.000000e+00> : vector<16xf32>
      %16 = vector.multi_reduction <add>, %15, %cst_11 [1] : vector<16x128xf32> to vector<16xf32>
      %17 = vector.shape_cast %16 : vector<16xf32> to vector<16x1xf32>
      %cst_12 = arith.constant 1.280000e+02 : f32
      %18 = vector.broadcast %cst_12 : f32 to vector<16x1xf32>
      %19 = arith.divf %17, %18 : vector<16x1xf32>
      %20 = vector.broadcast %19 : vector<16x1xf32> to vector<16x128xf32>
      %21 = arith.subf %15, %20 : vector<16x128xf32>
      %22 = arith.mulf %21, %21 : vector<16x128xf32>
      %cst_13 = arith.constant dense<0.000000e+00> : vector<16xf32>
      %23 = vector.multi_reduction <add>, %22, %cst_13 [1] : vector<16x128xf32> to vector<16xf32>
      %24 = vector.shape_cast %23 : vector<16xf32> to vector<16x1xf32>
      %cst_14 = arith.constant 1.270000e+02 : f32
      %25 = vector.broadcast %cst_14 : f32 to vector<16x1xf32>
      %26 = arith.divf %24, %25 : vector<16x1xf32>
      %27 = math.sqrt %26 : vector<16x1xf32>
      %cst_15 = arith.constant 9.99999997E-7 : f32
      %28 = vector.broadcast %cst_15 : f32 to vector<16x1xf32>
      %29 = arith.addf %27, %28 : vector<16x1xf32>
      %cst_16 = arith.constant 1.000000e+00 : f32
      %30 = vector.broadcast %cst_16 : f32 to vector<16x1xf32>
      %31 = arith.divf %30, %29 : vector<16x1xf32>
      %c0_17 = arith.constant 0 : index
      %c0_18 = arith.constant 0 : index
      %32 = vector.load %arg5[%c0_17, %c0_18] : memref<1x128xf32, #tpu.memory_space<vmem>>, vector<1x128xf32>
      %33 = vector.broadcast %31 : vector<16x1xf32> to vector<16x128xf32>
      %34 = arith.mulf %21, %33 : vector<16x128xf32>
      %35 = vector.broadcast %32 : vector<1x128xf32> to vector<16x128xf32>
      %36 = arith.mulf %35, %34 : vector<16x128xf32>
      %c0_19 = arith.constant 0 : index
      %c0_20 = arith.constant 0 : index
      %37 = vector.load %arg6[%c0_19, %c0_20] : memref<1x128xf32, #tpu.memory_space<vmem>>, vector<1x128xf32>
      %38 = vector.broadcast %37 : vector<1x128xf32> to vector<16x128xf32>
      %39 = arith.addf %36, %38 : vector<16x128xf32>
      %c0_21 = arith.constant 0 : index
      %c0_22 = arith.constant 0 : index
      %40 = vector.load %arg8[%c0_21, %c0_22] : memref<16x128xf32, #tpu.memory_space<vmem>>, vector<16x128xf32>
      tpu.vector_store %arg8[%c0_21, %c0_22], %39 {strides = array<i32>} : memref<16x128xf32, #tpu.memory_space<vmem>>, vector<16x128xf32>,
    } else {
    }
    %c0 = arith.constant 0 : index
    %c0_1 = arith.constant 0 : index
    %3 = vector.load %arg8[%c0, %c0_1] : memref<16x128xf32, #tpu.memory_space<vmem>>, vector<16x128xf32>
    %c0_2 = arith.constant 0 : index
    %c0_3 = arith.constant 0 : index
    %4 = vector.load %arg3[%c0_2, %c0_3] : memref<128x128xf32, #tpu.memory_space<vmem>>, vector<128x128xf32>
    %cst = arith.constant dense<0.000000e+00> : vector<16x128xf32>
    %5 = tpu.matmul %3, %4, %cst {dimension_numbers = #tpu.dot_dimension_numbers<[1], [0], [0], [1], [0, 0, 1, 1], [], []>} : vector<16x128xf32>, vector<128x128xf32>, vector<16x128xf32> -> vector<16x128xf32>
    %c0_4 = arith.constant 0 : index
    %c0_5 = arith.constant 0 : index
    %6 = vector.load %arg4[%c0_4, %c0_5] : memref<1x128xf32, #tpu.memory_space<vmem>>, vector<1x128xf32>
    %7 = vector.broadcast %6 : vector<1x128xf32> to vector<16x128xf32>
    %8 = arith.addf %5, %7 : vector<16x128xf32>
    %c128_i32 = arith.constant 128 : i32
    %9 = arith.muli %arg1, %c128_i32 : i32
    %10 = tpu.assume_multiple %9, 128 : i32
    %c0_6 = arith.constant 0 : index
    %11 = arith.index_cast %10 : i32 to index
    %12 = vector.load %arg2[%c0_6, %11] : memref<16x128xf32, #tpu.memory_space<vmem>>, vector<16x128xf32>
    %13 = arith.addf %12, %8 : vector<16x128xf32>
    %c0_7 = arith.constant 0 : index
    %c0_8 = arith.constant 0 : index
    %14 = vector.load %arg7[%c0_7, %c0_8] : memref<16x128xf32, #tpu.memory_space<vmem>>, vector<16x128xf32>
    tpu.vector_store %arg7[%c0_7, %c0_8], %13 {strides = array<i32>} : memref<16x128xf32, #tpu.memory_space<vmem>>, vector<16x128xf32>,
    return
  }
  func.func @transform_0(%arg0: i32, %arg1: i32) -> (i32, i32) {
    %c0_i32 = arith.constant 0 : i32
    %c0_i32_0 = arith.constant 0 : i32
    return %arg0, %c0_i32 : i32, i32
  }
  func.func @transform_1(%arg0: i32, %arg1: i32) -> (i32, i32) {
    %c0_i32 = arith.constant 0 : i32
    %c0_i32_0 = arith.constant 0 : i32
    return %c0_i32, %arg1 : i32, i32
  }
  func.func @transform_2(%arg0: i32, %arg1: i32) -> (i32, i32) {
    %c0_i32 = arith.constant 0 : i32
    %c0_i32_0 = arith.constant 0 : i32
    return %c0_i32, %arg1 : i32, i32
  }
  func.func @transform_3(%arg0: i32, %arg1: i32) -> (i32, i32) {
    %c0_i32 = arith.constant 0 : i32
    %c0_i32_0 = arith.constant 0 : i32
    %c0_i32_1 = arith.constant 0 : i32
    return %c0_i32, %c0_i32_0 : i32, i32
  }
  func.func @transform_4(%arg0: i32, %arg1: i32) -> (i32, i32) {
    %c0_i32 = arith.constant 0 : i32
    %c0_i32_0 = arith.constant 0 : i32
    %c0_i32_1 = arith.constant 0 : i32
    return %c0_i32, %c0_i32_0 : i32, i32
  }
  func.func @transform_5(%arg0: i32, %arg1: i32) -> (i32, i32) {
    %c0_i32 = arith.constant 0 : i32
    return %arg0, %arg1 : i32, i32
  }
}

</mosaic_0001>

<bundles_post_ra>
// kernel: sublayer_connection.1
= control target key start
LH: loop header
LB: loop body
LE: loop exit
PB: predicated region body
PF: predicated region fallthrough
CT: control target
= control target key end

     0   :  { %10 = vsyncpa [#allocation4], 0  ;;  %s526_s0 = inlined_call_operand.hbm [shape: f32[16,128], index: 0, kind: input, shape index: {}]   ;;  %s527_s1 = inlined_call_operand.hbm [shape: f32[128,128], index: 1, kind: input, shape index: {}]   ;;  %s528_s2 = inlined_call_operand.vmem [shape: f32[1,128], index: 2, kind: input, shape index: {}]   ;;  %s529_s3 = inlined_call_operand.vmem [shape: f32[1,128], index: 3, kind: input, shape index: {}]   ;;  %s530_s4 = inlined_call_operand.vmem [shape: f32[1,128], index: 4, kind: input, shape index: {}]   ;;  %s531_s5 = inlined_call_operand.hbm [shape: f32[16,128], index: 5, kind: output, shape index: {}]  }
   0x1   :  { %11 = vsyncpa [#allocation7], 0 }
   0x2   :  { %12 = vsyncpa [#allocation5], 0  ;;  %s417_s18 = smov [#allocation3]   ;;  %s345_s22 = scalar_lea.hbm %s526_s0, 256 }
   0x3   :  { %s18_s19 = sshll.u32 %s417_s18, 4  ;;  %p346_p0 = scmp.ne.s32.totalorder %s526_s0, %s345_s22  ;;  %s19_s19 = int_to_ptr.vmem [resolvable:$true] %s18_s19 }
   0x4   :  { %p349_p1 = scmp.lt.u32.totalorder %s345_s22, %s526_s0 }
   0x6   :  { %p351_p2 = pnand %p349_p1, %p346_p0 }
   0x8   :  { %354 = shalt.err (!%p351_p2)
}
   0x9   :  { %s355_s27 = scalar_lea.vmem %s19_s19, 256  ;;  %p360_p4 = scmp.lt.s32.totalorder %s19_s19, %s19_s19 }
   0xa   :  { %p356_p3 = scmp.ne.s32.totalorder %s19_s19, %s355_s27  ;;  %p361_p5 = scmp.lt.s32.totalorder %s355_s27, %s355_s27 }
   0xc   :  { %p362_p6 = por %p361_p5, %p360_p4 }
   0xe   :  { %p363_p7 = pnand %p362_p6, %p356_p3 }
  0x10   :  { %366 = shalt.err (!%p363_p7)
}
  0x11   :  { %s418_s28 = smov 128   ;;  %s419_s29 = smov 8  }
  0x12   :  { %24 = dma.hbm_to_vmem [thread:$0]  %s526_s0, 256, %s19_s19, [#allocation4], %s418_s28, %s418_s28, %s419_s29  }
  0x13   :  { %s420_s7 = smov [#allocation6]   ;;  %s367_s11 = scalar_lea.hbm %s527_s1, 2048 }
  0x14   :  { %s30_s8 = sshll.u32 %s420_s7, 4  ;;  %p368_p8 = scmp.ne.s32.totalorder %s527_s1, %s367_s11  ;;  %s31_s8 = int_to_ptr.vmem [resolvable:$true] %s30_s8 }
  0x15   :  { %p371_p9 = scmp.lt.u32.totalorder %s367_s11, %s527_s1 }
  0x17   :  { %p373_p10 = pnand %p371_p9, %p368_p8 }
  0x19   :  { %376 = shalt.err (!%p373_p10)
}
  0x1a   :  { %s377_s16 = scalar_lea.vmem %s31_s8, 2048  ;;  %p382_p12 = scmp.lt.s32.totalorder %s31_s8, %s31_s8 }
  0x1b   :  { %p378_p11 = scmp.ne.s32.totalorder %s31_s8, %s377_s16  ;;  %p383_p13 = scmp.lt.s32.totalorder %s377_s16, %s377_s16 }
  0x1d   :  { %p384_p0 = por %p383_p13, %p382_p12 }
  0x1f   :  { %p385_p1 = pnand %p384_p0, %p378_p11 }
  0x21   :  { %388 = shalt.err (!%p385_p1)
}
  0x22   :  { %36 = dma.hbm_to_vmem [thread:$0]  %s527_s1, 2048, %s31_s8, [#allocation7], %s418_s28, %s418_s28, %s419_s29  }
  0x23   :  { %411 = dma.done.wait [#allocation4], 256  }
  0x24   :  { %412 = vsyncadd [#allocation4], 4294967040 }
  0x25   :  { %413 = dma.done.wait [#allocation7], 2048  }
  0x26   :  { %414 = vsyncadd [#allocation7], 4294965248  ;;  %v482_v0 = vld [vmem:[#allocation3] sm:$0xff]  ;;  %v485_v1 = vld [vmem:[#allocation3 + $0x8] sm:$0xff] }
  0x27   :  { %55 = vadd.xlane.f32.xlu0 %v482_v0  ;;  %v117_v10 = vld [vmem:[#allocation6] sm:$0xff]  ;;  %v118_v11 = vld [vmem:[#allocation6 + $0x8] sm:$0xff]  ;;  %v119_v13 = vld [vmem:[#allocation6 + $0x10] sm:$0xff] }
  0x28   :  { %v300_v12 = vpack.c.bf16 %v118_v11, %v117_v10  ;;  %v120_v14 = vld [vmem:[#allocation6 + $0x18] sm:$0xff]  ;;  %v121_v16 = vld [vmem:[#allocation6 + $0x20] sm:$0xff]  ;;  %v122_v17 = vld [vmem:[#allocation6 + $0x28] sm:$0xff] }
  0x29   :  { %v304_v15 = vpack.c.bf16 %v120_v14, %v119_v13  ;;  %v308_v18 = vpack.c.bf16 %v122_v17, %v121_v16  ;;  %v123_v19 = vld [vmem:[#allocation6 + $0x30] sm:$0xff]  ;;  %v124_v20 = vld [vmem:[#allocation6 + $0x38] sm:$0xff]  ;;  %v125_v22 = vld [vmem:[#allocation6 + $0x40] sm:$0xff] }
  0x2a   :  { %301 = vmatprep.subr.bf16.mxu0 %v300_v12  ;;  %v312_v21 = vpack.c.bf16 %v124_v20, %v123_v19  ;;  %v126_v23 = vld [vmem:[#allocation6 + $0x48] sm:$0xff]  ;;  %v127_v24 = vld [vmem:[#allocation6 + $0x50] sm:$0xff]  ;;  %v128_v26 = vld [vmem:[#allocation6 + $0x58] sm:$0xff] }
  0x2b   :  { %57 = vadd.xlane.f32.xlu0 %v485_v1  ;;  %303 = vmatpush3.bf16.msra.mxu0 %v300_v12  ;;  %v316_v25 = vpack.c.bf16 %v126_v23, %v125_v22  ;;  %v320_v27 = vpack.c.bf16 %v128_v26, %v127_v24  ;;  %v129_v28 = vld [vmem:[#allocation6 + $0x60] sm:$0xff]  ;;  %v130_v29 = vld [vmem:[#allocation6 + $0x68] sm:$0xff]  ;;  %v131_v31 = vld [vmem:[#allocation6 + $0x70] sm:$0xff] }
  0x2c   :  { %305 = vmatprep.subr.bf16.mxu0 %v304_v15  ;;  %v324_v30 = vpack.c.bf16 %v130_v29, %v129_v28  ;;  %v132_v32 = vld [vmem:[#allocation6 + $0x78] sm:$0xff]  ;;  %v244_v51 = vld [vmem:[%s529_s3] ss:$0 sm:$0xff]  ;;  %s421_s3 = smov [#allocation8]  }
  0x2d   :  { %v328_v33 = vpack.c.bf16 %v132_v32, %v131_v31  ;;  %v245_v53 = vld [vmem:[%s530_s4] ss:$0 sm:$0xff]  ;;  %s230_s23 = sshll.u32 %s421_s3, 4  ;;  %s231_s23 = int_to_ptr.vmem [resolvable:$true] %s230_s23 }
  0x2e   :  { %v246_v60 = vld [vmem:[%s528_s2] ss:$0 sm:$0xff]  ;;  %s389_s4 = scalar_lea.vmem %s231_s23, 256  ;;  %p394_p3 = scmp.lt.s32.totalorder %s231_s23, %s231_s23 }
  0x2f   :  { %307 = vmatpush3.bf16.msra.mxu0 %v304_v15  ;;  %p390_p2 = scmp.ne.s32.totalorder %s231_s23, %s389_s4  ;;  %p395_p4 = scmp.lt.s32.totalorder %s389_s4, %s389_s4 }
  0x30   :  { %309 = vmatprep.subr.bf16.mxu0 %v308_v18 }
  0x31   :  { %p396_p5 = por %p395_p4, %p394_p3 }
  0x33   :  { %311 = vmatpush3.bf16.msra.mxu0 %v308_v18  ;;  %p397_p6 = pnand %p396_p5, %p390_p2 }
  0x34   :  { %313 = vmatprep.subr.bf16.mxu0 %v312_v21 }
  0x37   :  { %315 = vmatpush3.bf16.msra.mxu0 %v312_v21 }
  0x38   :  { %317 = vmatprep.subr.bf16.mxu0 %v316_v25 }
  0x3b   :  { %319 = vmatpush3.bf16.msra.mxu0 %v316_v25 }
  0x3c   :  { %321 = vmatprep.subr.bf16.mxu0 %v320_v27 }
  0x3f   :  { %323 = vmatpush3.bf16.msra.mxu0 %v320_v27 }
  0x40   :  { %325 = vmatprep.subr.bf16.mxu0 %v324_v30 }
  0x43   :  { %327 = vmatpush3.bf16.msra.mxu0 %v324_v30 }
  0x44   :  { %329 = vmatprep.subr.bf16.mxu0 %v328_v33 }
  0x47   :  { %331 = vmatpush3.bf16.msra.mxu0 %v328_v33 }
  0xb4   :  { %v56_v2 = vpop.xlane.xlu0 %55 }
  0xb5   :  { %v60_v3 = vmul.f32 0.0078125, %v56_v2 }
  0xb7   :  { %v489_v4 = vsub.f32 %v482_v0, %v60_v3 }
  0xb8   :  { %v58_v5 = vpop.xlane.xlu0 %57 }
  0xb9   :  { %v61_v6 = vmul.f32 0.0078125, %v58_v5  ;;  %v64_v7 = vmul.f32 %v489_v4, %v489_v4 }
  0xbb   :  { %v494_v8 = vsub.f32 %v485_v1, %v61_v6  ;;  %66 = vadd.xlane.f32.xlu1 %v64_v7 }
  0xbd   :  { %v65_v9 = vmul.f32 %v494_v8, %v494_v8 }
  0xbf   :  { %68 = vadd.xlane.f32.xlu1 %v65_v9 }
 0x148   :  { %v67_v34 = vpop.xlane.xlu1 %66 }
 0x149   :  { %v71_v35 = vmul.f32 0.007874016, %v67_v34 }
 0x14b   :  { %337 = vrsqrt.f32 %v71_v35  ;;  %vm75_vm0 = vcmp.eq.f32.partialorder %v71_v35, inf  ;;  %v78_v40 = vand.u32 2147483648, %v71_v35  ;;  %vm77_vm1 = vcmp.eq.f32.partialorder %v71_v35, 0.0 }
 0x14c   :  { %v69_v36 = vpop.xlane.xlu1 %68 }
 0x14d   :  { %v72_v37 = vmul.f32 0.007874016, %v69_v36 }
 0x14f   :  { %339 = vrsqrt.f32 %v72_v37  ;;  %vm82_vm2 = vcmp.eq.f32.partialorder %v72_v37, inf  ;;  %v85_v46 = vand.u32 2147483648, %v72_v37  ;;  %vm84_vm3 = vcmp.eq.f32.partialorder %v72_v37, 0.0 }
 0x155   :  { %v338_v38 = vpop.eup %337 }
 0x156   :  { %v74_v39 = vmul.f32 %v338_v38, %v71_v35 }
 0x158   :  { %v76_v41 = vsel %vm75_vm0, %v71_v35, %v74_v39 }
 0x159   :  { %v340_v42 = vpop.eup %339  ;;  %v79_v43 = vsel %vm77_vm1, %v78_v40, %v76_v41 }
 0x15a   :  { %v81_v44 = vmul.f32 %v340_v42, %v72_v37  ;;  %v87_v45 = vadd.f32 1e-06, %v79_v43 }
 0x15c   :  { %v83_v47 = vsel %vm82_vm2, %v72_v37, %v81_v44  ;;  %341 = vrcp.f32 %v87_v45 }
 0x15d   :  { %v86_v48 = vsel %vm84_vm3, %v85_v46, %v83_v47 }
 0x15e   :  { %v88_v49 = vadd.f32 1e-06, %v86_v48 }
 0x160   :  { %343 = vrcp.f32 %v88_v49 }
 0x166   :  { %v342_v50 = vpop.eup %341 }
 0x167   :  { %v94_v52 = vmul.f32 %v342_v50, %v489_v4 }
 0x169   :  { %v102_v54 = vmul.f32 %v244_v51, %v94_v52 }
 0x16a   :  { %v344_v55 = vpop.eup %343 }
 0x16b   :  { %v95_v56 = vmul.f32 %v344_v55, %v494_v8  ;;  %v111_v57 = vadd.f32 %v245_v53, %v102_v54 }
 0x16d   :  { %v103_v58 = vmul.f32 %v244_v51, %v95_v56  ;;  %297 = vmatprep.mubr.f32.mxu0 %v111_v57 }
 0x16f   :  { %v112_v59 = vadd.f32 %v245_v53, %v103_v58 }
 0x171   :  { %298 = vmatmul.mubr.f32.vlgmr.msra.gmra.mrb[0].mxu0 %v112_v59 }
 0x244   :  { %v299_v61 = vpop.f32.mrb[0].mxu0 }
 0x245   :  { %v212_v62 = vadd.f32 %v299_v61, %v246_v60  ;;  %v206_v63 = vpop.f32.mrb[1].mxu0 }
 0x246   :  { %v207_v2 = vadd.f32 %v246_v60, %v206_v63 }
 0x247   :  { %v222_v3 = vadd.f32 %v212_v62, %v485_v1 }
 0x248   :  { %v221_v4 = vadd.f32 %v207_v2, %v482_v0 }
 0x249   :  { %224 = vst [vmem:[#allocation8 + $0x8] sm:$0xff] %v222_v3 }
 0x24a   :  { %223 = vst [vmem:[#allocation8] sm:$0xff] %v221_v4 }
 0x24b   :  { %400 = shalt.err (!%p397_p6)
}
 0x24c   :  { %s401_s25 = scalar_lea.hbm %s531_s5, 256 }
 0x24d   :  { %p402_p7 = scmp.ne.s32.totalorder %s531_s5, %s401_s25  ;;  %p405_p8 = scmp.lt.u32.totalorder %s401_s25, %s531_s5 }
 0x24f   :  { %p407_p9 = pnand %p405_p8, %p402_p7 }
 0x251   :  { %410 = shalt.err (!%p407_p9)
}
 0x252   :  { %236 = dma.vmem_to_hbm [thread:$0]  %s231_s23, 256, %s531_s5, [#allocation5], %s418_s28, %s418_s28, %s419_s29  }
 0x253   :  { %415 = dma.done.wait [#allocation5], 256  }
 0x254   :  { %416 = vsyncadd [#allocation5], 4294967040 }
 0x255   :  { %240 = vsyncpa [#allocation4], 1 }
 0x256   :  { %241 = vsyncpa [#allocation7], 1 }
 0x257   :  { %242 = vsyncpa [#allocation5], 1 }

</bundles_post_ra>
